<compile_context>
chip_gen: v5e
topology: v5e:2x2
jax: 0.10.0
libtpu: 0.0.40
codegen_flags: <defaults>
</compile_context>

<pallas_src>
import functools

import jax
import jax.numpy as jnp
from jax.experimental import pallas as pl
from jax.experimental.pallas import tpu as pltpu


def _gap_kernel(x_ref, o_ref, *, inv_hw):
    # x_ref: (TM, H*W) lane-dense tile of rows; reduce each row over the
    # flattened spatial axis and scale by the constant 1/(H*W).
    x = x_ref[...].astype(jnp.float32)
    s = jnp.sum(x, axis=-1, keepdims=True) * inv_hw  # (TM, 1), f32 accumulate
    o_ref[...] = s.astype(o_ref.dtype)


def global_avg_pool2d(x, *, target_block_bytes=2 * 1024 * 1024):
    """Equivalent of F.avg_pool2d(x, kernel_size=x.size()[2:]) for NCHW x."""
    N, C, H, W = x.shape
    R = N * C
    HW = H * W

    # Lane-dense 2D view: one row per (n, c) spatial plane.
    x2 = x.reshape(R, HW)

    # Pick the row-tile size: multiple of 8 sublanes, ~target_block_bytes per
    # block (double-buffered input stays < every chip's scoped-VMEM default).
    itemsize = jnp.dtype(x.dtype).itemsize
    rows_per_block = max(1, target_block_bytes // max(1, HW * itemsize))
    tm = min(rows_per_block, R)
    tm = max(8, ((tm + 7) // 8) * 8)  # round up to a sublane multiple
    num_tiles = (R + tm - 1) // tm
    r_pad = num_tiles * tm

    if r_pad != R:
        # Pad rows so the block shape divides the array exactly; padded rows
        # are computed (cheap) and sliced off below.
        x2 = jnp.pad(x2, ((0, r_pad - R), (0, 0)))

    out = pl.pallas_call(
        functools.partial(_gap_kernel, inv_hw=1.0 / float(HW)),
        out_shape=jax.ShapeDtypeStruct((r_pad, 1), x.dtype),
        grid=(num_tiles,),
        in_specs=[pl.BlockSpec((tm, HW), lambda i: (i, 0))],
        out_specs=pl.BlockSpec((tm, 1), lambda i: (i, 0)),
        compiler_params=pltpu.CompilerParams(
            dimension_semantics=("parallel",),
        ),
    )(x2)

    return out[:R].reshape(N, C, 1, 1)


if __name__ == "__main__":
    key = jax.random.PRNGKey(0)
    # Small NCHW input consistent with a conv-net feature map.
    x = jax.random.normal(key, (2, 4, 16, 16), dtype=jnp.float32)

    out = global_avg_pool2d(x)
    out = jax.block_until_ready(out)

    # Reference check (plain JAX) for the same semantics.
    ref = jnp.mean(x, axis=(2, 3), keepdims=True)
    assert out.shape == (2, 4, 1, 1), out.shape
    assert jnp.allclose(out, ref, atol=1e-5, rtol=1e-5), "mismatch vs reference"

    print("KERNEL_OK")
</pallas_src>

<mosaic_0001>
module attributes {stable_mosaic.version = 11 : i64} {
  func.func @_gap_kernel(%arg0: i32, %arg1: memref<8x256xf32, #tpu.memory_space<vmem>>, %arg2: memref<8x1xf32, #tpu.memory_space<vmem>>) attributes {dimension_semantics = [#tpu.dimension_semantics<parallel>], iteration_bounds = array<i64: 1>, scalar_prefetch = 0 : i64, scratch_operands = 0 : i64, tpu.core_type = #tpu.core_type<tc>, window_params = [{transform_indices = @transform_0, window_bounds = array<i64: 8, 256>}, {transform_indices = @transform_1, window_bounds = array<i64: 8, 1>}]} {
    %c0 = arith.constant 0 : index
    %c0_0 = arith.constant 0 : index
    %0 = vector.load %arg1[%c0, %c0_0] : memref<8x256xf32, #tpu.memory_space<vmem>>, vector<8x256xf32>
    %cst = arith.constant dense<0.000000e+00> : vector<8xf32>
    %1 = vector.multi_reduction <add>, %0, %cst [1] : vector<8x256xf32> to vector<8xf32>
    %2 = vector.shape_cast %1 : vector<8xf32> to vector<8x1xf32>
    %cst_1 = arith.constant 3.906250e-03 : f32
    %3 = vector.broadcast %cst_1 : f32 to vector<8x1xf32>
    %4 = arith.mulf %2, %3 : vector<8x1xf32>
    %c0_2 = arith.constant 0 : index
    %c0_3 = arith.constant 0 : index
    %5 = vector.load %arg2[%c0_2, %c0_3] : memref<8x1xf32, #tpu.memory_space<vmem>>, vector<8x1xf32>
    tpu.vector_store %arg2[%c0_2, %c0_3], %4 {strides = array<i32>} : memref<8x1xf32, #tpu.memory_space<vmem>>, vector<8x1xf32>,
    return
  }
  func.func @transform_0(%arg0: i32) -> (i32, i32) {
    %c0_i32 = arith.constant 0 : i32
    %c0_i32_0 = arith.constant 0 : i32
    return %arg0, %c0_i32 : i32, i32
  }
  func.func @transform_1(%arg0: i32) -> (i32, i32) {
    %c0_i32 = arith.constant 0 : i32
    %c0_i32_0 = arith.constant 0 : i32
    return %arg0, %c0_i32 : i32, i32
  }
}

</mosaic_0001>

<bundles_post_ra>
// kernel: tpu_custom_call.1
= control target key start
LH: loop header
LB: loop body
LE: loop exit
PB: predicated region body
PF: predicated region fallthrough
CT: control target
= control target key end

     0   :  { %6 = vsyncpa [#allocation3], 0  ;;  %s62_s9 = smov [#allocation2]   ;;  %s79_s0 = inlined_call_operand.hbm [shape: f32[8,256], index: 0, kind: input, shape index: {}]   ;;  %s80_s1 = inlined_call_operand.vmem [shape: f32[8,1], index: 1, kind: output, shape index: {}]  }
   0x1   :  { %s12_s8 = sshll.u32 %s79_s0, 4  ;;  %s14_s10 = sshll.u32 %s62_s9, 4  ;;  %s13_s8 = int_to_ptr.hbm [resolvable:$true] %s12_s8  ;;  %s15_s10 = int_to_ptr.vmem [resolvable:$true] %s14_s10 }
   0x2   :  { %17 = dma.hbm_to_vmem [thread:$0]  %s13_s8, 256, %s15_s10, [#allocation3]  }
   0x3   :  { %60 = dma.done.wait [#allocation3], 256  }
   0x4   :  { %61 = vsyncadd [#allocation3], 4294967040  ;;  %v22_v0 = vld [vmem:[#allocation2] sm:$0xff]  ;;  %v23_v1 = vld [vmem:[#allocation2 + $0x8] sm:$0xff]  ;;  %vm28_vm0 = vcmask 7168  }
   0x5   :  { %v24_v2 = vadd.f32 %v23_v1, %v22_v0 }
   0x7   :  { %25 = vadd.xlane.f32.xlu0 %v24_v2 }
  0x7a   :  { %v26_v3 = vpop.xlane.xlu0 %25 }
  0x7b   :  { %v27_v4 = vmul.f32 0.00390625, %v26_v3 }
  0x7d   :  { %29 = vst.msk [vmem:[%s80_s1] sm:$0xff] %vm28_vm0, %v27_v4 }
  0x7e   :  { %34 = vsyncpa [#allocation3], 1 }

</bundles_post_ra>
